<compile_context>
chip_gen: v7x
topology: tpu7x:2x2x1
jax: 0.10.0
libtpu: 0.0.40
codegen_flags: <defaults>
</compile_context>

<pallas_src>
import jax
import jax.numpy as jnp
from jax import lax
from jax.experimental import pallas as pl
from jax.experimental.pallas import tpu as pltpu


def _round_up(a, b):
    return (a + b - 1) // b * b


def _onehot_gather_kernel(idx_ref, x_ref, o_ref):
    """idx_ref: VMEM (tb, 1) int32; x_ref: VMEM (n1, td); o_ref: VMEM (tb, td).

    Row gather as a one-hot matmul on the MXU. Indices outside [0, n1) (the
    "shadow" row n1, padded tail rows, or garbage in a clipped tail block) give
    an all-zero one-hot row, i.e. a zero output row, for free.
    """
    n1 = x_ref.shape[0]
    tb = o_ref.shape[0]
    idx_col = idx_ref[...]                                        # (tb, 1)
    row_ids = lax.broadcasted_iota(jnp.int32, (tb, n1), 1)        # (tb, n1)
    one_hot = (idx_col == row_ids).astype(x_ref.dtype)            # (tb, n1)
    o_ref[...] = jnp.dot(
        one_hot, x_ref[...], preferred_element_type=jnp.float32
    ).astype(o_ref.dtype)


def _take_gather_kernel(idx_ref, x_ref, o_ref):
    """Dynamic row gather on the VMEM-resident x tile (cost independent of n1).

    Used when n1 is large enough that the one-hot matmul FLOPs (2*tb*n1*td)
    would exceed the memory-bound time.
    """
    n1 = x_ref.shape[0]
    idx_col = idx_ref[...]                                        # (tb, 1)
    safe = jnp.clip(idx_col[:, 0], 0, n1 - 1)                     # (tb,)
    rows = jnp.take(x_ref[...], safe, axis=0)                     # (tb, td)
    valid = jnp.logical_and(idx_col >= 0, idx_col < n1)           # (tb, 1)
    o_ref[...] = jnp.where(valid, rows, jnp.zeros_like(rows)).astype(o_ref.dtype)


def _x_block_spec(n1, td):
    index_map = lambda j, i: (0, j)
    try:
        # x's block index is constant across the inner (row-block) grid axis, so
        # a second pipeline buffer only doubles its VMEM footprint without
        # adding any overlap -> single-buffer it.
        return pl.BlockSpec((n1, td), index_map, pipeline_mode=pl.Buffered(1))
    except TypeError:  # older jax: BlockSpec without pipeline_mode support
        return pl.BlockSpec((n1, td), index_map)


def nearest_upsample(x, inds, *, block_rows=512, feat_cols=None,
                     onehot_max_rows=4096):
    """closest_pool: out[i] = concat(x, zeros(1, d))[inds[i, 0]] without the concat."""
    n1, d = x.shape
    n2 = inds.shape[0]
    itemsize = jnp.dtype(x.dtype).itemsize

    # Lane-dense feature dim (multiple of 128).
    d_pad = _round_up(max(d, 128), 128)
    if d_pad != d:
        x = jnp.pad(x, ((0, 0), (0, d_pad - d)))

    # Row block: multiple of the dtype's sublane packing (8 f32, 16 bf16, 32 int8).
    pack = max(8, 32 // itemsize)
    tb = _round_up(max(1, min(block_rows, n2)), pack)

    # Only the first index column is used. No clamping needed for the one-hot
    # path: any index outside [0, n1) just yields a zero row.
    idx = inds[:, :1].astype(jnp.int32)                           # (n2, 1)

    use_onehot = n1 <= onehot_max_rows

    # ---- VMEM budgeting (generation aware: 64 MiB v7x, 128 MiB v5e/v6e) ----
    try:
        vmem_cap = pltpu.get_tpu_info().vmem_capacity_bytes
    except Exception:
        vmem_cap = 64 * 1024 * 1024                               # conservative
    budget = int(vmem_cap * 0.85)          # leave headroom for internal scratch

    def footprint(tb_, td_):
        fp = _round_up(n1, pack) * td_ * itemsize        # resident x tile (1 buffer)
        fp += 2 * tb_ * td_ * itemsize                   # double-buffered out block
        fp += 2 * tb_ * 128 * 4                          # idx blocks (lane padded)
        if use_onehot:
            fp += tb_ * _round_up(n1, 128) * (4 + itemsize)   # iota + one-hot temps
        else:
            fp += 2 * tb_ * td_ * itemsize               # gather/select temporaries
        return fp

    td = d_pad if feat_cols is None else min(d_pad, _round_up(feat_cols, 128))
    while footprint(tb, td) > budget and td > 128:
        td = max(128, _round_up(td // 2, 128))
    while footprint(tb, td) > budget and tb > pack:
        tb = max(pack, _round_up(tb // 2, pack))
    # TODO(synk): if footprint still exceeds the budget here (huge n1*d), fall
    # back to the HBM row-gather path described at the top of the file.

    need = footprint(tb, td)
    vmem_limit = min(budget, max(32 * 1024 * 1024, int(need * 1.5) + (4 << 20)))

    grid = (pl.cdiv(d_pad, td), pl.cdiv(n2, tb))   # feature tiles outer, rows inner

    kernel = _onehot_gather_kernel if use_onehot else _take_gather_kernel
    flops = 2 * n2 * n1 * d_pad if use_onehot else 0
    bytes_accessed = ((n1 + n2) * d_pad * itemsize   # x read once + out written once
                      + n2 * 4 * grid[0])            # idx column re-read per feat tile

    out = pl.pallas_call(
        kernel,
        # Rows are NOT padded: the cdiv grid lets Pallas clip the tail block,
        # so no post-kernel row-slice copy is needed.
        out_shape=jax.ShapeDtypeStruct((n2, d_pad), x.dtype),
        grid_spec=pltpu.PrefetchScalarGridSpec(
            num_scalar_prefetch=0,
            grid=grid,
            in_specs=[
                pl.BlockSpec((tb, 1), lambda j, i: (i, 0)),   # index column block
                _x_block_spec(n1, td),                        # resident x tile
            ],
            out_specs=pl.BlockSpec((tb, td), lambda j, i: (i, j)),
        ),
        compiler_params=pltpu.CompilerParams(
            dimension_semantics=("parallel", "parallel"),
            vmem_limit_bytes=vmem_limit,
        ),
        cost_estimate=pl.CostEstimate(
            flops=flops, transcendentals=0, bytes_accessed=bytes_accessed),
    )(idx, x)

    return out if d_pad == d else out[:, :d]


class NearestUpsampleBlock:
    """Mirror of the PyTorch module (no parameters)."""

    def __init__(self, layer_ind, block_rows=512, feat_cols=None):
        self.layer_ind = layer_ind
        self.block_rows = block_rows
        self.feat_cols = feat_cols

    def __call__(self, x, batch):
        # `batch` may be the KPConv batch object (with .upsamples) or a plain list.
        upsamples = getattr(batch, "upsamples", batch)
        return nearest_upsample(x, upsamples[self.layer_ind - 1],
                                block_rows=self.block_rows,
                                feat_cols=self.feat_cols)

    def __repr__(self):
        return "NearestUpsampleBlock(layer: {:d} -> {:d})".format(
            self.layer_ind, self.layer_ind - 1)


if __name__ == "__main__":
    key = jax.random.PRNGKey(0)
    k1, k2 = jax.random.split(key)

    # Small shapes consistent with the module: n1 coarse points -> n2 fine points.
    n1, d = 24, 256
    n2, max_num = 40, 8

    x = jax.random.normal(k1, (n1, d), dtype=jnp.float32)
    # Indices in [0, n1]; value n1 means "no neighbor" -> gathers the shadow zero row.
    inds = jax.random.randint(k2, (n2, max_num), 0, n1 + 1, dtype=jnp.int32)

    # Small blocks on purpose so the 2-D grid (feature tiles x row blocks) and the
    # clipped tail row block are exercised even at these toy shapes.
    block = NearestUpsampleBlock(layer_ind=1, block_rows=16, feat_cols=128)
    out = jax.block_until_ready(block(x, [inds]))

    # Pure-JAX reference (same semantics as closest_pool / gather).
    x_pad = jnp.concatenate([x, jnp.zeros((1, d), x.dtype)], axis=0)
    ref = x_pad[inds[:, 0]]
    assert out.shape == (n2, d) and out.dtype == x.dtype
    assert jnp.allclose(out, ref), "mismatch vs f32 reference gather"

    # bf16 path (sublane packing 16) through the same one-hot MXU kernel.
    out_bf16 = jax.block_until_ready(
        nearest_upsample(x.astype(jnp.bfloat16), inds, block_rows=16))
    ref_bf16 = jnp.concatenate(
        [x.astype(jnp.bfloat16), jnp.zeros((1, d), jnp.bfloat16)], axis=0)[inds[:, 0]]
    assert out_bf16.shape == (n2, d) and out_bf16.dtype == jnp.bfloat16
    assert jnp.array_equal(out_bf16, ref_bf16), "mismatch vs bf16 reference gather"

    print("KERNEL_OK")
</pallas_src>

<mosaic_0001>
module attributes {stable_mosaic.version = 11 : i64} {
  func.func @_onehot_gather_kernel(%arg0: i32, %arg1: i32, %arg2: memref<16x1xi32, #tpu.memory_space<vmem>>, %arg3: memref<24x128xf32, #tpu.memory_space<vmem>>, %arg4: memref<16x128xf32, #tpu.memory_space<vmem>>) attributes {dimension_semantics = [#tpu.dimension_semantics<parallel>, #tpu.dimension_semantics<parallel>], iteration_bounds = array<i64: 2, 3>, scalar_prefetch = 0 : i64, scratch_operands = 0 : i64, tpu.core_type = #tpu.core_type<tc>, window_params = [{transform_indices = @transform_0, window_bounds = array<i64: 16, 1>}, {pipeline_mode = #tpu.pipeline_mode<synchronous>, transform_indices = @transform_1, window_bounds = array<i64: 24, 128>}, {transform_indices = @transform_2, window_bounds = array<i64: 16, 128>}]} {
    %c0 = arith.constant 0 : index
    %c0_0 = arith.constant 0 : index
    %0 = vector.load %arg2[%c0, %c0_0] : memref<16x1xi32, #tpu.memory_space<vmem>>, vector<16x1xi32>
    %1 = tpu.iota {dimensions = array<i32: 1>} : vector<16x24xi32>
    %2 = vector.broadcast %0 : vector<16x1xi32> to vector<16x24xi32>
    %3 = arith.cmpi eq, %2, %1 : vector<16x24xi32>
    %4 = arith.extui %3 : vector<16x24xi1> to vector<16x24xi32>
    %5 = arith.sitofp %4 : vector<16x24xi32> to vector<16x24xf32>
    %c0_1 = arith.constant 0 : index
    %c0_2 = arith.constant 0 : index
    %6 = vector.load %arg3[%c0_1, %c0_2] : memref<24x128xf32, #tpu.memory_space<vmem>>, vector<24x128xf32>
    %cst = arith.constant dense<0.000000e+00> : vector<16x128xf32>
    %7 = tpu.matmul %5, %6, %cst {dimension_numbers = #tpu.dot_dimension_numbers<[1], [0], [0], [1], [0, 0, 1, 1], [], []>} : vector<16x24xf32>, vector<24x128xf32>, vector<16x128xf32> -> vector<16x128xf32>
    %c0_3 = arith.constant 0 : index
    %c0_4 = arith.constant 0 : index
    %8 = vector.load %arg4[%c0_3, %c0_4] : memref<16x128xf32, #tpu.memory_space<vmem>>, vector<16x128xf32>
    tpu.vector_store %arg4[%c0_3, %c0_4], %7 {strides = array<i32>} : memref<16x128xf32, #tpu.memory_space<vmem>>, vector<16x128xf32>,
    return
  }
  func.func @transform_0(%arg0: i32, %arg1: i32) -> (i32, i32) {
    %c0_i32 = arith.constant 0 : i32
    %c0_i32_0 = arith.constant 0 : i32
    return %arg1, %c0_i32 : i32, i32
  }
  func.func @transform_1(%arg0: i32, %arg1: i32) -> (i32, i32) {
    %c0_i32 = arith.constant 0 : i32
    %c0_i32_0 = arith.constant 0 : i32
    return %c0_i32, %arg0 : i32, i32
  }
  func.func @transform_2(%arg0: i32, %arg1: i32) -> (i32, i32) {
    %c0_i32 = arith.constant 0 : i32
    return %arg1, %arg0 : i32, i32
  }
}

</mosaic_0001>

<bundles_post_ra>
// kernel: tpu_custom_call.1
= control target key start
LH: loop header
LB: loop body
LE: loop exit
PB: predicated region body
PF: predicated region fallthrough
CT: control target
= control target key end

     0   :  { %7 = vsyncpa [#allocation3], 0  ;;  %s997_s0 = inlined_call_operand.vmem [shape: s32[40,1], index: 0, kind: input, shape index: {}]   ;;  %s998_s1 = inlined_call_operand.hbm [shape: f32[24,256], index: 1, kind: input, shape index: {}]   ;;  %s999_s2 = inlined_call_operand.hbm [shape: f32[40,256], index: 2, kind: output, shape index: {}]  }
   0x1   :  { %8 = vsyncpa [#allocation4], 0 }
   0x2   :  { %10 = vsyncpa [#allocation4 + $0x1], 0  ;;  %s750_s9 = smov 0   ;;  %s752_s10 = smov 0  }
   0x3   :  { %s754_s11 = smov 0   ;;  %s756_s12 = smov 0  }
   0x4   :  { %s758_s13 = smov 0   ;;  %s760_s14 = smov 0  }
   0x5   :  { %s762_s15 = smov 0   ;;  %s764_s16 = smov 0  }
   0x6   :  { %s766_s17 = smov 0   ;;  %s768_s18 = smov 0  }
   0x7   :  { %s770_s19 = smov 0  }
   0x8 LB: > { %s419_s20 = sadd.s32 4294967295, %s723_s19   ;;  %s420_s21 = sadd.s32 4294967294, %s723_s19   ;;  %s723_s19 = sphi %s770_s19, %s16_s19   ;;  %s719_s18 = sphi %s768_s18, %s1022_s18   ;;  %s715_s17 = sphi %s766_s17, %s1021_s17   ;;  %s711_s16 = sphi %s764_s16, %s1020_s16   ;;  %s707_s15 = sphi %s762_s15, %s1019_s15   ;;  %s703_s14 = sphi %s760_s14, %s1018_s14   ;;  %s699_s13 = sphi %s758_s13, %s1017_s13   ;;  %s695_s12 = sphi %s756_s12, %s1016_s12   ;;  %s691_s11 = sphi %s754_s11, %s1015_s11   ;;  %s687_s10 = sphi %s752_s10, %s1014_s10   ;;  %s683_s9 = sphi %s750_s9, %s1013_s9  }
   0x9   : > { %s25_s22 = sadd.s32 1, %s715_s17  ;;  %s28_s23 = sadd.s32 1, %s719_s18 }
   0xa   : > { %p26_p0 = scmp.ge.s32.totalorder %s25_s22, 3  ;;  %s61_s24 = sadd.s32 1, %s703_s14 }
   0xb   : > { %p74_p1 = scmp.ne.s32.totalorder %s699_s13, %s695_s12  ;;  %p815_p2 = scmp.eq.s32.totalorder %s419_s20, 0 }
   0xc   : > { %s1024_s22 = smov (%p26_p0, %s25_s22), 0  ;;  %s1026_s23 = smov (!%p26_p0, %s28_s23), %s719_s18 }
   0xd   : > { %s84_s26 = ssub.s32 %s715_s17, %s1024_s22  ;;  %p30_p3 = scmp.ge.s32.totalorder %s1026_s23, 2 }
   0xe   : > { %s89_s27 = sadd.s32 1, %s691_s11  ;;  %p99_p4 = scmp.ne.s32.totalorder %s691_s11, %s687_s10 }
   0xf   : > { %p100_p5 = scmp.eq.s32.totalorder %s419_s20, 5  ;;  %s1028_s23 = smov (%p30_p3, %s1026_s23), 0 }
  0x10   : > { %p105_p7 = scmp.ne.s32.totalorder %s687_s10, %s683_s9  ;;  %s58_s29 = ssub.s32 %s719_s18, %s1028_s23 }
  0x11   : > { %p826_p6 = por %p100_p5, %p99_p4  ;;  %p106_p8 = scmp.eq.s32.totalorder %s420_s21, 5 }
  0x12   : > { %p59_p9 = scmp.eq.s32.totalorder %s58_s29, 0  ;;  %s86_s30 = sor.u32 %s84_s26, %s58_s29 }
  0x13   : > { %s1004_s28 = scalar_select %p826_p6, 1, 0 }
  0x14   : > { %p87_p10 = scmp.eq.s32.totalorder %s86_s30, 0  ;;  %p834_p11 = por %p106_p8, %p105_p7 }
  0x15   : > { %s839_s4 = scalar_select %p59_p9, %s703_s14, %s61_s24  }
  0x16   : > { %s1005_s3 = scalar_select %p834_p11, 1, 0 }
  0x17   : > { %s842_s5 = scalar_select %p87_p10, %s691_s11, %s89_s27  }
  0x18   : > { %p421_p12 = scmp.ge.s32.totalorder %s723_s19, 1  ;;  %p113_p13 = scmp.lt.s32.totalorder %s723_s19, 7 }
  0x19   : > { %s422_s6 = sshll.u32 %s711_s16, 7  ;;  %p852_p0 = por %p815_p2, %p74_p1 }
  0x1a   : > { %p856_p3 = pnand %p421_p12, %p113_p13  ;;  %s863_s24 = scalar_lea.hbm %s998_s1, %s422_s6 }
  0x1b   : > { %s1006_s7 = scalar_select %p852_p0, 1, 0 }
  0x1c   : > { %s1007_s8 = scalar_select %p856_p3, 1, 0 }
  0x1d   : > { %s725_s12 = smov [#allocation2]   ;;  %p464_p1 = pneg %p856_p3 }
  0x1e   : > { %s127_s25 = sshll.u32 %s725_s12, 4  ;;  %s571_s27 = scalar_lea.hbm %s863_s24, 384  ;;  %s867_s25 = int_to_ptr.vmem [resolvable:$true] %s127_s25 }
  0x1f   : > { %p871_p2 = pnand %p464_p1, %p852_p0  ;;  %p572_p4 = scmp.ne.s32.totalorder %s863_s24, %s571_s27 }
  0x20   : > { %s576_s6 = scalar_lea.hbm %s998_s1, 768  ;;  %p577_p9 = scmp.lt.u32.totalorder %s863_s24, %s998_s1 }
  0x21   : > { %p573_p5 = pneg %p871_p2  ;;  %p578_p10 = scmp.lt.u32.totalorder %s576_s6, %s571_s27 }
  0x22   : > { %p580_p13 = scmp.lt.u32.totalorder %s571_s27, %s863_s24 }
  0x23   : > { %p574_p7 = pnand %p573_p5, %p572_p4  ;;  %p579_p12 = por %p578_p10, %p577_p9 }
  0x25   : > { %p575_p8 = pneg %p574_p7  ;;  %p581_p1 = por %p580_p13, %p579_p12 }
  0x27   : > { %p582_p11 = pnand %p581_p1, %p575_p8 }
  0x29   : > { %585 = shalt.err (!%p582_p11)
}
  0x2a   : > { %s586_s12 = scalar_lea.vmem %s867_s25, 384  ;;  %p594_p0 = scmp.lt.s32.totalorder %s867_s25, %s867_s25 }
  0x2b   : > { %p587_p4 = scmp.ne.s32.totalorder %s867_s25, %s586_s12  ;;  %p595_p3 = scmp.lt.s32.totalorder %s586_s12, %s586_s12 }
  0x2d   : > { %p589_p7 = pnand %p587_p4, %p573_p5  ;;  %p596_p9 = por %p595_p3, %p594_p0 }
  0x2f   : > { %p590_p6 = pneg %p589_p7 }
  0x31   : > { %p597_p10 = pnand %p596_p9, %p590_p6 }
  0x33   : > { %600 = shalt.err (!%p597_p10)
}
  0x34   : > { %s726_s27 = smov 256   ;;  %s727_s29 = smov 128  }
  0x35   : > { %s728_s30 = smov 8   ;;  %p1009_p11 = scmp.ne.s32.totalorder %s1007_s8, 0 }
  0x36   : > { %467 = dma.hbm_to_vmem [thread:$0]  (!%p871_p2), %s863_s24, 384, %s867_s25, [#allocation3], %s726_s27, %s727_s29, %s728_s30  }
  0x37   : > { %160 = sbr.rel (%p1009_p11) target bundleno = 450 (0x1c2), region = 28  ;;  %p1010_p5 = scmp.ne.s32.totalorder (!%p1009_p11), %s1006_s7, 0 }
  0x3e   : > { %674 = dma.done.wait (%p1010_p5), [#allocation3], 384  }
  0x3f   : > { %676 = vsyncadd (%p1010_p5), [#allocation3], 4294966912  ;;  %s908_s6 = sshll.u32 %s707_s15, 1  ;;  %v729_v0 = vmov 0   ;;  %v221_v2 = vld [vmem:[#allocation2] sm:$0xff]  ;;  %v222_v3 = vld [vmem:[#allocation2 + $0x8] sm:$0xff]  ;;  %v207_v7 = vlaneseq }
  0x40   : > { %570 = vset.pattern.permute.xlu0 %v729_v0  ;;  %p191_p6 = scmp.lt.s32.totalorder %s908_s6, 4  ;;  %v457_v5 = vpack.c.bf16 %v222_v3, %v221_v2  ;;  %v223_v6 = vld [vmem:[#allocation2 + $0x10] sm:$0xff]  ;;  %vm224_vm0 = vcmask 195584   ;;  %v730_v10 = vmov 0.0   ;;  %s183_s7 = sand.u32 1, %s687_s10  }
  0x41   : > { %v208_v8 = vand.u32 127, %v207_v7  ;;  %s425_s21 = sshll.u32 %s183_s7, 4  ;;  %s916_s27 = scalar_lea.sflag [#allocation4], %s183_s7 }
  0x42   : > { %s192_s20 = scalar_select %p191_p6, %s908_s6, 4  ;;  %458 = vmatprep.subr.bf16.mxu0 %v457_v5 }
  0x43   : > { %460 = vmatpush3.bf16.msra.mxu0 %v457_v5  ;;  %s185_s12 = scalar_lea.vmem [#allocation5], %s425_s21  ;;  %p1011_p0 = scmp.ne.s32.totalorder %s1004_s28, 0 }
  0x44   : > { %s427_s26 = sshll.u32 %s192_s20, 3  ;;  %452 = vmatprep.subr.mxu0 %v223_v6  ;;  %s317_s29 = ssub.s32 (%p1011_p0), 5, %s908_s6 }
  0x45   : > { %s194_s8 = scalar_lea.vmem %s997_s0, %s427_s26  ;;  %p318_p3 = scmp.lt.s32.totalorder (%p1011_p0), %s317_s29, 2 }
  0x46   : > { %v205_v1 = vld [vmem:[%s194_s8] sm:$0xff]  ;;  %v206_v4 = vld [vmem:[%s194_s8 + $0x8] sm:$0xff] }
  0x47   : > { %210 = vperm.xlu0 %570, %v205_v1   ;;  %453 = vmatpush3.msra.mxu0 %v223_v6 }
  0x4b   : > { %213 = vperm.xlu0 %570, %v206_v4  }
  0xc6   : > { %v211_v9 = vpop.permute.xlu0 %210 }
  0xc7   : > { %vm215_vm1 = vcmp.eq.s32.totalorder %v211_v9, %v208_v8 }
  0xc8   : > { %v428_v11 = vsel %vm215_vm1, 1.0, %v730_v10 }
  0xc9   : > { %454 = vmatprep.mubr.msk.f32.mxu0 %vm224_vm0, %v428_v11 }
  0xca   : > { %v214_v12 = vpop.permute.xlu0 %213 }
  0xcb   : > { %vm216_vm2 = vcmp.eq.s32.totalorder %v214_v12, %v208_v8 }
  0xcc   : > { %v429_v13 = vsel %vm216_vm2, 1.0, %v730_v10 }
  0xcd   : > { %455 = vmatmul.mubr.msk.f32.vlgmr.msra.gmra.mrb[0].mxu0 %vm224_vm0, %v429_v13 }
 0x19c   : > { %315 = sbr.rel (!%p1011_p0) target bundleno = 450 (0x1c2), region = 36 }
 0x1a0   : > { %v456_v14 = vpop.f32.mrb[0].mxu0 }
 0x1a1   : > { %307 = vst [vmem:[%s185_s12 + $0x8] sm:$0xff] %v456_v14  ;;  %v297_v15 = vpop.f32.mrb[1].mxu0 }
 0x1a2   : > { %306 = vst [vmem:[%s185_s12] sm:$0xff] %v297_v15 }
 0x1a3   : > { %s1030_s29 = smov (!%p318_p3, %s317_s29), 2 }
 0x1a4   : > { %s921_s30 = sshll.u32 %s1030_s29, 7 }
 0x1a5   : > { %s322_s20 = ssub.s32 256, %s921_s30 }
 0x1a6   : > { %323 = vsyncadd %s916_s27, %s322_s20  ;;  %p435_p2 = scmp.ne.s32.totalorder %s921_s30, 0  ;;  %s442_s26 = sshll.u32 %s707_s15, 2 }
 0x1a7   : > { %s326_s24 = sadd.s32 %s711_s16, %s442_s26  ;;  %s330_s28 = sshll.u32 %s185_s12, 4  ;;  %s928_s28 = int_to_ptr.vmem [resolvable:$true] %s330_s28 }
 0x1a8   : > { %s437_s25 = sshll.u32 %s326_s24, 7  ;;  %s601_s21 = scalar_lea.vmem %s928_s28, %s921_s30 }
 0x1a9   : > { %s933_s7 = scalar_lea.hbm %s999_s2, %s437_s25  ;;  %p602_p8 = scmp.ne.s32.totalorder %s928_s28, %s601_s21 }
 0x1aa   : > { %s731_s29 = smov [#allocation5]  }
 0x1ab   : > { %p603_p12 = pnand %p602_p8, %p435_p2  ;;  %s605_s15 = sshll.u32 %s731_s29, 4  ;;  %s606_s15 = int_to_ptr.vmem [resolvable:$false] %s605_s15 }
 0x1ac   : > { %s607_s16 = scalar_lea.vmem %s606_s15, 512  ;;  %p608_p1 = scmp.lt.s32.totalorder %s928_s28, %s606_s15 }
 0x1ad   : > { %p604_p13 = pneg %p603_p12  ;;  %p609_p4 = scmp.lt.s32.totalorder %s607_s16, %s601_s21 }
 0x1af   : > { %p610_p7 = por %p609_p4, %p608_p1 }
 0x1b1   : > { %p611_p9 = pnand %p610_p7, %p604_p13 }
 0x1b3   : > { %614 = shalt.err (!%p611_p9)
}
 0x1b4   : > { %s615_s12 = scalar_lea.hbm %s933_s7, %s921_s30  ;;  %s619_s24 = scalar_lea.hbm %s999_s2, 1280 }
 0x1b5   : > { %p616_p10 = scmp.ne.s32.totalorder %s933_s7, %s615_s12  ;;  %p620_p6 = scmp.lt.u32.totalorder %s933_s7, %s999_s2 }
 0x1b6   : > { %p621_p0 = scmp.lt.u32.totalorder %s619_s24, %s615_s12  ;;  %p623_p8 = scmp.lt.u32.totalorder %s615_s12, %s933_s7 }
 0x1b7   : > { %p617_p11 = pnand %p616_p10, %p435_p2 }
 0x1b8   : > { %p622_p3 = por %p621_p0, %p620_p6 }
 0x1b9   : > { %p618_p5 = pneg %p617_p11 }
 0x1ba   : > { %p624_p12 = por %p623_p8, %p622_p3 }
 0x1bc   : > { %p625_p13 = pnand %p624_p12, %p618_p5 }
 0x1be   : > { %628 = shalt.err (!%p625_p13)
}
 0x1bf   : > { %s732_s8 = smov 128   ;;  %s733_s21 = smov 256  }
 0x1c0   : > { %s734_s29 = smov 8  }
 0x1c1   : > { %336 = dma.vmem_to_hbm [thread:$0]  (%p435_p2), %s928_s28, %s921_s30, %s933_s7, %s916_s27, %s732_s8, %s733_s21, %s734_s29  }
 0x1c2 PF: > { %p472_p1 = scmp.ge.s32.totalorder %s723_s19, 2  ;;  %s345_s15 = sand.u32 1, %s683_s9  }
 0x1c3   : > { %p1012_p4 = scmp.ne.s32.totalorder %s1005_s3, 0  ;;  %s346_s16 = scalar_lea.sflag [#allocation4], %s345_s15 }
 0x1c5   : > { %p469_p7 = pnand %p472_p1, %p1012_p4 }
 0x1c7   : > { %678 = dma.done.wait (!%p469_p7), %s346_s16, 256  }
 0x1c8   : > { %680 = vsyncadd (!%p469_p7), %s346_s16, 4294967040  ;;  %s16_s19 = sadd.s32 1, %s723_s19   ;;  %s1013_s9 = smov %s687_s10 }
 0x1c9   : > { %p13_p9 = scmp.ge.s32.totalorder %s16_s19, 8   ;;  %s1014_s10 = smov %s691_s11 }
 0x1ca   : > { %s1015_s11 = smov %s842_s5  ;;  %s1016_s12 = smov %s699_s13 }
 0x1cb   : > { %s1017_s13 = smov %s703_s14  ;;  %s1018_s14 = smov %s839_s4 }
 0x1cc   : > { %s1019_s15 = smov %s715_s17  ;;  %s1020_s16 = smov %s719_s18 }
 0x1cd   : > { %s1021_s17 = smov %s1024_s22  ;;  %s1022_s18 = smov %s1028_s23 }
 0x1ce   :  { %15 = sbr.rel (!%p13_p9) target bundleno = 8 (0x8), region = 69 }
 0x1d5   :  { %351 = vsyncpa [#allocation3], 1 }
 0x1d6   :  { %353 = vsyncpa [#allocation3 + $0x1], 1 }
 0x1d7   :  { %354 = vsyncpa [#allocation4], 1 }
 0x1d8   :  { %356 = vsyncpa [#allocation4 + $0x1], 1 }

</bundles_post_ra>
